<compile_context>
chip_gen: v5e
topology: v5e:2x2
jax: 0.10.0
libtpu: 0.0.40
codegen_flags: <defaults>
</compile_context>

<pallas_src>
import functools

import jax
import jax.numpy as jnp
from jax.experimental import pallas as pl
from jax.experimental.pallas import tpu as pltpu


LANE = 128          # pad K/N dims to multiples of this
SUBLANE_BF16 = 16   # batch-tile multiple for bf16 inputs


def _round_up(n, m):
    return ((n + m - 1) // m) * m


def _dqn_mlp_kernel(x_ref, w1_ref, b1_ref, w2_ref, b2_ref, w3_ref, b3_ref, o_ref):
    # Layer 1: bf16 x bf16 -> f32 accumulate on the MXU; elementwise in f32.
    h1 = jnp.dot(x_ref[...], w1_ref[...], preferred_element_type=jnp.float32)
    h1 = jnp.maximum(h1 + b1_ref[...], 0.0)
    # Layer 2.
    h2 = jnp.dot(h1.astype(jnp.bfloat16), w2_ref[...],
                 preferred_element_type=jnp.float32)
    h2 = jnp.maximum(h2 + b2_ref[...], 0.0)
    # Layer 3: Q-values, no activation.
    out = jnp.dot(h2.astype(jnp.bfloat16), w3_ref[...],
                  preferred_element_type=jnp.float32)
    o_ref[...] = (out + b3_ref[...]).astype(o_ref.dtype)


def init_params(key, input_dim, action_dim, hidden_size=128):
    """PyTorch-style nn.Linear init. Weights stored as (in, out) = W.T, f32."""
    ks = jax.random.split(key, 6)

    def lin(kw, kb, fan_in, fan_out):
        bound = 1.0 / jnp.sqrt(fan_in)
        w = jax.random.uniform(kw, (fan_in, fan_out), jnp.float32, -bound, bound)
        b = jax.random.uniform(kb, (fan_out,), jnp.float32, -bound, bound)
        return w, b

    w1, b1 = lin(ks[0], ks[1], input_dim, hidden_size)
    w2, b2 = lin(ks[2], ks[3], hidden_size, hidden_size)
    w3, b3 = lin(ks[4], ks[5], hidden_size, action_dim)
    return (w1, b1, w2, b2, w3, b3)


def pack_params(raw_params, input_dim, action_dim, hidden_size):
    """Zero-pad K/N dims to 128 multiples; cast weights to bf16, keep biases f32."""
    w1, b1, w2, b2, w3, b3 = raw_params
    kp = _round_up(input_dim, LANE)
    hp = _round_up(hidden_size, LANE)
    npad = _round_up(action_dim, LANE)

    w1p = jnp.zeros((kp, hp), jnp.float32).at[:input_dim, :hidden_size].set(w1)
    w2p = jnp.zeros((hp, hp), jnp.float32).at[:hidden_size, :hidden_size].set(w2)
    w3p = jnp.zeros((hp, npad), jnp.float32).at[:hidden_size, :action_dim].set(w3)
    b1p = jnp.zeros((1, hp), jnp.float32).at[0, :hidden_size].set(b1)
    b2p = jnp.zeros((1, hp), jnp.float32).at[0, :hidden_size].set(b2)
    b3p = jnp.zeros((1, npad), jnp.float32).at[0, :action_dim].set(b3)

    return (w1p.astype(jnp.bfloat16), b1p,
            w2p.astype(jnp.bfloat16), b2p,
            w3p.astype(jnp.bfloat16), b3p)


@functools.partial(jax.jit, static_argnames=("action_dim", "block_batch"))
def dqn_forward(x, packed_params, action_dim, block_batch=512):
    """Fused forward pass. Batch tiled on a 'parallel' grid; weights resident."""
    w1, b1, w2, b2, w3, b3 = packed_params
    batch, in_dim = x.shape
    kp, hp = w1.shape
    npad = w3.shape[1]

    # Batch tile: multiple of 16 (bf16 sublane packing), capped at block_batch.
    tb = min(block_batch, _round_up(max(batch, 1), SUBLANE_BF16))
    bp = _round_up(batch, tb)
    grid = (bp // tb,)

    # Pad batch + input_dim with zeros, cast x to bf16 for the MXU.
    xp = jnp.zeros((bp, kp), jnp.bfloat16).at[:batch, :in_dim].set(
        x.astype(jnp.bfloat16))

    const = lambda i: (0, 0)  # weights/biases: one resident block, DMA'd once.
    flops = 2 * bp * (kp * hp + hp * hp + hp * npad)
    bytes_accessed = (xp.size * 2 + (w1.size + w2.size + w3.size) * 2
                      + (b1.size + b2.size + b3.size) * 4 + bp * npad * 4)

    out_p = pl.pallas_call(
        _dqn_mlp_kernel,
        out_shape=jax.ShapeDtypeStruct((bp, npad), jnp.float32),
        grid=grid,
        in_specs=[
            pl.BlockSpec((tb, kp), lambda i: (i, 0)),   # x: batch-tiled
            pl.BlockSpec((kp, hp), const),              # w1
            pl.BlockSpec((1, hp), const),               # b1
            pl.BlockSpec((hp, hp), const),              # w2
            pl.BlockSpec((1, hp), const),               # b2
            pl.BlockSpec((hp, npad), const),            # w3
            pl.BlockSpec((1, npad), const),             # b3
        ],
        out_specs=pl.BlockSpec((tb, npad), lambda i: (i, 0)),
        compiler_params=pltpu.CompilerParams(
            dimension_semantics=("parallel",),
            vmem_limit_bytes=32 * 1024 * 1024,
        ),
        cost_estimate=pl.CostEstimate(
            flops=flops, transcendentals=0, bytes_accessed=bytes_accessed),
    )(xp, w1, b1, w2, b2, w3, b3)

    # Drop batch / action_dim padding.
    return out_p[:batch, :action_dim]


if __name__ == "__main__":
    key = jax.random.PRNGKey(0)
    k_param, k_x = jax.random.split(key)

    batch, input_dim, action_dim, hidden = 8, 32, 8, 128
    raw_params = init_params(k_param, input_dim, action_dim, hidden)
    packed = pack_params(raw_params, input_dim, action_dim, hidden)
    x = jax.random.normal(k_x, (batch, input_dim), jnp.float32)

    out = jax.block_until_ready(dqn_forward(x, packed, action_dim))

    # Pure-JAX f32 reference (original module semantics).
    w1, b1, w2, b2, w3, b3 = raw_params
    ref = jnp.maximum(x @ w1 + b1[None, :], 0.0)
    ref = jnp.maximum(ref @ w2 + b2[None, :], 0.0)
    ref = ref @ w3 + b3[None, :]

    assert out.shape == (batch, action_dim)
    # Loose tolerance: matmul inputs are bf16 (f32 accumulation).
    assert jnp.allclose(out, ref, atol=5e-2, rtol=5e-2), (
        float(jnp.max(jnp.abs(out - ref))))

    print("KERNEL_OK")
</pallas_src>

<mosaic_0001>
module attributes {stable_mosaic.version = 11 : i64} {
  func.func @_dqn_mlp_kernel(%arg0: i32, %arg1: memref<16x128xbf16, #tpu.memory_space<vmem>>, %arg2: memref<128x128xbf16, #tpu.memory_space<vmem>>, %arg3: memref<1x128xf32, #tpu.memory_space<vmem>>, %arg4: memref<128x128xbf16, #tpu.memory_space<vmem>>, %arg5: memref<1x128xf32, #tpu.memory_space<vmem>>, %arg6: memref<128x128xbf16, #tpu.memory_space<vmem>>, %arg7: memref<1x128xf32, #tpu.memory_space<vmem>>, %arg8: memref<16x128xf32, #tpu.memory_space<vmem>>) attributes {dimension_semantics = [#tpu.dimension_semantics<parallel>], iteration_bounds = array<i64: 1>, scalar_prefetch = 0 : i64, scratch_operands = 0 : i64, tpu.core_type = #tpu.core_type<tc>, window_params = [{transform_indices = @transform_0, window_bounds = array<i64: 16, 128>}, {pipeline_mode = #tpu.pipeline_mode<synchronous>, transform_indices = @transform_1, window_bounds = array<i64: 128, 128>}, {pipeline_mode = #tpu.pipeline_mode<synchronous>, transform_indices = @transform_2, window_bounds = array<i64: 1, 128>}, {pipeline_mode = #tpu.pipeline_mode<synchronous>, transform_indices = @transform_3, window_bounds = array<i64: 128, 128>}, {pipeline_mode = #tpu.pipeline_mode<synchronous>, transform_indices = @transform_4, window_bounds = array<i64: 1, 128>}, {pipeline_mode = #tpu.pipeline_mode<synchronous>, transform_indices = @transform_5, window_bounds = array<i64: 128, 128>}, {pipeline_mode = #tpu.pipeline_mode<synchronous>, transform_indices = @transform_6, window_bounds = array<i64: 1, 128>}, {transform_indices = @transform_7, window_bounds = array<i64: 16, 128>}]} {
    %c0 = arith.constant 0 : index
    %c0_0 = arith.constant 0 : index
    %0 = vector.load %arg1[%c0, %c0_0] : memref<16x128xbf16, #tpu.memory_space<vmem>>, vector<16x128xbf16>
    %c0_1 = arith.constant 0 : index
    %c0_2 = arith.constant 0 : index
    %1 = vector.load %arg2[%c0_1, %c0_2] : memref<128x128xbf16, #tpu.memory_space<vmem>>, vector<128x128xbf16>
    %cst = arith.constant dense<0.000000e+00> : vector<16x128xf32>
    %2 = tpu.matmul %0, %1, %cst {dimension_numbers = #tpu.dot_dimension_numbers<[1], [0], [0], [1], [0, 0, 1, 1], [], []>} : vector<16x128xbf16>, vector<128x128xbf16>, vector<16x128xf32> -> vector<16x128xf32>
    %c0_3 = arith.constant 0 : index
    %c0_4 = arith.constant 0 : index
    %3 = vector.load %arg3[%c0_3, %c0_4] : memref<1x128xf32, #tpu.memory_space<vmem>>, vector<1x128xf32>
    %4 = vector.broadcast %3 : vector<1x128xf32> to vector<16x128xf32>
    %5 = arith.addf %2, %4 : vector<16x128xf32>
    %cst_5 = arith.constant 0.000000e+00 : f32
    %6 = vector.broadcast %cst_5 : f32 to vector<16x128xf32>
    %7 = arith.maximumf %5, %6 : vector<16x128xf32>
    %8 = arith.truncf %7 : vector<16x128xf32> to vector<16x128xbf16>
    %c0_6 = arith.constant 0 : index
    %c0_7 = arith.constant 0 : index
    %9 = vector.load %arg4[%c0_6, %c0_7] : memref<128x128xbf16, #tpu.memory_space<vmem>>, vector<128x128xbf16>
    %cst_8 = arith.constant dense<0.000000e+00> : vector<16x128xf32>
    %10 = tpu.matmul %8, %9, %cst_8 {dimension_numbers = #tpu.dot_dimension_numbers<[1], [0], [0], [1], [0, 0, 1, 1], [], []>} : vector<16x128xbf16>, vector<128x128xbf16>, vector<16x128xf32> -> vector<16x128xf32>
    %c0_9 = arith.constant 0 : index
    %c0_10 = arith.constant 0 : index
    %11 = vector.load %arg5[%c0_9, %c0_10] : memref<1x128xf32, #tpu.memory_space<vmem>>, vector<1x128xf32>
    %12 = vector.broadcast %11 : vector<1x128xf32> to vector<16x128xf32>
    %13 = arith.addf %10, %12 : vector<16x128xf32>
    %cst_11 = arith.constant 0.000000e+00 : f32
    %14 = vector.broadcast %cst_11 : f32 to vector<16x128xf32>
    %15 = arith.maximumf %13, %14 : vector<16x128xf32>
    %16 = arith.truncf %15 : vector<16x128xf32> to vector<16x128xbf16>
    %c0_12 = arith.constant 0 : index
    %c0_13 = arith.constant 0 : index
    %17 = vector.load %arg6[%c0_12, %c0_13] : memref<128x128xbf16, #tpu.memory_space<vmem>>, vector<128x128xbf16>
    %cst_14 = arith.constant dense<0.000000e+00> : vector<16x128xf32>
    %18 = tpu.matmul %16, %17, %cst_14 {dimension_numbers = #tpu.dot_dimension_numbers<[1], [0], [0], [1], [0, 0, 1, 1], [], []>} : vector<16x128xbf16>, vector<128x128xbf16>, vector<16x128xf32> -> vector<16x128xf32>
    %c0_15 = arith.constant 0 : index
    %c0_16 = arith.constant 0 : index
    %19 = vector.load %arg7[%c0_15, %c0_16] : memref<1x128xf32, #tpu.memory_space<vmem>>, vector<1x128xf32>
    %20 = vector.broadcast %19 : vector<1x128xf32> to vector<16x128xf32>
    %21 = arith.addf %18, %20 : vector<16x128xf32>
    %c0_17 = arith.constant 0 : index
    %c0_18 = arith.constant 0 : index
    %22 = vector.load %arg8[%c0_17, %c0_18] : memref<16x128xf32, #tpu.memory_space<vmem>>, vector<16x128xf32>
    tpu.vector_store %arg8[%c0_17, %c0_18], %21 {strides = array<i32>} : memref<16x128xf32, #tpu.memory_space<vmem>>, vector<16x128xf32>,
    return
  }
  func.func @transform_0(%arg0: i32) -> (i32, i32) {
    %c0_i32 = arith.constant 0 : i32
    %c0_i32_0 = arith.constant 0 : i32
    return %arg0, %c0_i32 : i32, i32
  }
  func.func @transform_1(%arg0: i32) -> (i32, i32) {
    %c0_i32 = arith.constant 0 : i32
    %c0_i32_0 = arith.constant 0 : i32
    %c0_i32_1 = arith.constant 0 : i32
    return %c0_i32, %c0_i32_0 : i32, i32
  }
  func.func @transform_2(%arg0: i32) -> (i32, i32) {
    %c0_i32 = arith.constant 0 : i32
    %c0_i32_0 = arith.constant 0 : i32
    %c0_i32_1 = arith.constant 0 : i32
    return %c0_i32, %c0_i32_0 : i32, i32
  }
  func.func @transform_3(%arg0: i32) -> (i32, i32) {
    %c0_i32 = arith.constant 0 : i32
    %c0_i32_0 = arith.constant 0 : i32
    %c0_i32_1 = arith.constant 0 : i32
    return %c0_i32, %c0_i32_0 : i32, i32
  }
  func.func @transform_4(%arg0: i32) -> (i32, i32) {
    %c0_i32 = arith.constant 0 : i32
    %c0_i32_0 = arith.constant 0 : i32
    %c0_i32_1 = arith.constant 0 : i32
    return %c0_i32, %c0_i32_0 : i32, i32
  }
  func.func @transform_5(%arg0: i32) -> (i32, i32) {
    %c0_i32 = arith.constant 0 : i32
    %c0_i32_0 = arith.constant 0 : i32
    %c0_i32_1 = arith.constant 0 : i32
    return %c0_i32, %c0_i32_0 : i32, i32
  }
  func.func @transform_6(%arg0: i32) -> (i32, i32) {
    %c0_i32 = arith.constant 0 : i32
    %c0_i32_0 = arith.constant 0 : i32
    %c0_i32_1 = arith.constant 0 : i32
    return %c0_i32, %c0_i32_0 : i32, i32
  }
  func.func @transform_7(%arg0: i32) -> (i32, i32) {
    %c0_i32 = arith.constant 0 : i32
    %c0_i32_0 = arith.constant 0 : i32
    return %arg0, %c0_i32 : i32, i32
  }
}

</mosaic_0001>

<bundles_post_ra>
// kernel: dqn_forward.1
= control target key start
LH: loop header
LB: loop body
LE: loop exit
PB: predicated region body
PF: predicated region fallthrough
CT: control target
= control target key end

     0   :  { %12 = vsyncpa [#allocation3], 0  ;;  %s622_s0 = inlined_call_operand.vmem [shape: bf16[16,128], index: 0, kind: input, shape index: {}]   ;;  %s623_s1 = inlined_call_operand.hbm [shape: bf16[128,128], index: 1, kind: input, shape index: {}]   ;;  %s624_s2 = inlined_call_operand.vmem [shape: f32[1,128], index: 2, kind: input, shape index: {}]   ;;  %s625_s3 = inlined_call_operand.hbm [shape: bf16[128,128], index: 3, kind: input, shape index: {}]   ;;  %s626_s4 = inlined_call_operand.vmem [shape: f32[1,128], index: 4, kind: input, shape index: {}]   ;;  %s627_s5 = inlined_call_operand.hbm [shape: bf16[128,128], index: 5, kind: input, shape index: {}]   ;;  %s628_s6 = inlined_call_operand.vmem [shape: f32[1,128], index: 6, kind: input, shape index: {}]   ;;  %s629_s7 = inlined_call_operand.vmem [shape: f32[16,128], index: 7, kind: output, shape index: {}]  }
   0x1   :  { %13 = vsyncpa [#allocation5], 0  ;;  %s35_s26 = sshll.u32 %s625_s3, 4  ;;  %s550_s27 = smov [#allocation4]   ;;  %s36_s26 = int_to_ptr.hbm [resolvable:$true] %s35_s26 }
   0x2   :  { %s37_s28 = sshll.u32 %s550_s27, 4  ;;  %s20_s8 = sshll.u32 %s623_s1, 4  ;;  %s38_s28 = int_to_ptr.vmem [resolvable:$true] %s37_s28  ;;  %s21_s8 = int_to_ptr.hbm [resolvable:$true] %s20_s8 }
   0x3   :  { %s551_s9 = smov 64   ;;  %s552_s10 = smov 4  }
   0x4   :  { %43 = dma.hbm_to_vmem [thread:$0]  %s36_s26, 1024, %s38_s28, [#allocation5], %s551_s9, %s551_s9, %s552_s10  }
   0x5   :  { %s553_s11 = smov [#allocation2]   ;;  %s50_s15 = sshll.u32 %s627_s5, 4  ;;  %s51_s15 = int_to_ptr.hbm [resolvable:$true] %s50_s15 }
   0x6   :  { %s22_s12 = sshll.u32 %s553_s11, 4  ;;  %s554_s3 = smov [#allocation6]   ;;  %s23_s12 = int_to_ptr.vmem [resolvable:$true] %s22_s12 }
   0x7   :  { %28 = dma.hbm_to_vmem [thread:$0]  %s21_s8, 1024, %s23_s12, [#allocation3], %s551_s9, %s551_s9, %s552_s10  }
   0x8   :  { %s52_s16 = sshll.u32 %s554_s3, 4  ;;  %s53_s16 = int_to_ptr.vmem [resolvable:$true] %s52_s16 }
   0x9   :  { %58 = dma.hbm_to_vmem [thread:$0]  %s51_s15, 1024, %s53_s16, [#allocation5], %s551_s9, %s551_s9, %s552_s10  }
   0xa   :  { %546 = dma.done.wait [#allocation3], 1024  }
   0xb   :  { %547 = vsyncadd [#allocation3], 4294966272 }
   0xc   :  { %548 = dma.done.wait [#allocation5], 2048  }
   0xd   :  { %549 = vsyncadd [#allocation5], 4294965248  ;;  %v449_v0 = vld [vmem:[#allocation2 + $0x38] sm:$0xff]  ;;  %v448_v1 = vld [vmem:[#allocation2 + $0x30] sm:$0xff] }
   0xe   :  { %149 = vmatpush.bf16.msra.mxu0 %v449_v0  ;;  %v457_v2 = vld [vmem:[#allocation4 + $0x38] sm:$0xff]  ;;  %v456_v3 = vld [vmem:[#allocation4 + $0x30] sm:$0xff]  ;;  %v447_v4 = vld [vmem:[#allocation2 + $0x28] sm:$0xff] }
   0xf   :  { %234 = vmatpush.bf16.msra.mxu1 %v457_v2  ;;  %v455_v5 = vld [vmem:[#allocation4 + $0x28] sm:$0xff]  ;;  %v446_v6 = vld [vmem:[#allocation2 + $0x20] sm:$0xff]  ;;  %v445_v8 = vld [vmem:[#allocation2 + $0x18] sm:$0xff] }
  0x10   :  { %v454_v7 = vld [vmem:[#allocation4 + $0x20] sm:$0xff]  ;;  %v444_v9 = vld [vmem:[#allocation2 + $0x10] sm:$0xff]  ;;  %v443_v10 = vld [vmem:[#allocation2 + $0x8] sm:$0xff] }
  0x11   :  { %v442_v11 = vld [vmem:[#allocation2] sm:$0xff]  ;;  %v453_v13 = vld [vmem:[#allocation4 + $0x18] sm:$0xff]  ;;  %v452_v14 = vld [vmem:[#allocation4 + $0x10] sm:$0xff] }
  0x12   :  { %150 = vmatpush.bf16.msra.mxu0 %v448_v1  ;;  %v441_v12 = vld [vmem:[%s622_s0] sm:$0xff]  ;;  %v451_v15 = vld [vmem:[#allocation4 + $0x8] sm:$0xff]  ;;  %v465_v17 = vld [vmem:[#allocation6 + $0x38] sm:$0xff] }
  0x13   :  { %235 = vmatpush.bf16.msra.mxu1 %v456_v3  ;;  %v450_v16 = vld [vmem:[#allocation4] sm:$0xff]  ;;  %319 = vmatpush.bf16.msra.mxu2 %v465_v17  ;;  %v464_v18 = vld [vmem:[#allocation6 + $0x30] sm:$0xff]  ;;  %v463_v19 = vld [vmem:[#allocation6 + $0x28] sm:$0xff] }
  0x14   :  { %v462_v20 = vld [vmem:[#allocation6 + $0x20] sm:$0xff]  ;;  %v461_v29 = vld [vmem:[#allocation6 + $0x18] sm:$0xff]  ;;  %v460_v30 = vld [vmem:[#allocation6 + $0x10] sm:$0xff] }
  0x15   :  { %v471_v22 = vld [vmem:[%s624_s2] ss:$0 sm:$0xff]  ;;  %v459_v31 = vld [vmem:[#allocation6 + $0x8] sm:$0xff] }
  0x16   :  { %151 = vmatpush.bf16.msra.mxu0 %v447_v4  ;;  %v458_v32 = vld [vmem:[#allocation6] sm:$0xff] }
  0x17   :  { %236 = vmatpush.bf16.msra.mxu1 %v455_v5  ;;  %320 = vmatpush.bf16.msra.mxu2 %v464_v18  ;;  %v472_v34 = vld [vmem:[%s626_s4] ss:$0 sm:$0xff] }
  0x18   :  { %v473_v41 = vld [vmem:[%s628_s6] ss:$0 sm:$0xff] }
  0x1a   :  { %152 = vmatpush.bf16.msra.mxu0 %v446_v6 }
  0x1b   :  { %237 = vmatpush.bf16.msra.mxu1 %v454_v7  ;;  %321 = vmatpush.bf16.msra.mxu2 %v463_v19 }
  0x1e   :  { %153 = vmatpush.bf16.msra.mxu0 %v445_v8 }
  0x1f   :  { %238 = vmatpush.bf16.msra.mxu1 %v453_v13  ;;  %322 = vmatpush.bf16.msra.mxu2 %v462_v20 }
  0x22   :  { %154 = vmatpush.bf16.msra.mxu0 %v444_v9 }
  0x23   :  { %239 = vmatpush.bf16.msra.mxu1 %v452_v14  ;;  %323 = vmatpush.bf16.msra.mxu2 %v461_v29 }
  0x26   :  { %155 = vmatpush.bf16.msra.mxu0 %v443_v10 }
  0x27   :  { %240 = vmatpush.bf16.msra.mxu1 %v451_v15  ;;  %324 = vmatpush.bf16.msra.mxu2 %v460_v30 }
  0x2a   :  { %156 = vmatpush.bf16.msra.mxu0 %v442_v11 }
  0x2b   :  { %241 = vmatpush.bf16.msra.mxu1 %v450_v16  ;;  %325 = vmatpush.bf16.msra.mxu2 %v459_v31 }
  0x2d   :  { %157 = vmatmul.bf16.vlgmr.msra.gmra.mxu0 %v441_v12 }
  0x2f   :  { %326 = vmatpush.bf16.msra.mxu2 %v458_v32 }
  0xaa   :  { %v158_v21 = vpop.f32.mrf.mxu0 }
  0xab   :  { %v159_v23 = vadd.f32 %v471_v22, %v158_v21 }
  0xad   :  { %v163_v26 = vmax.f32 %v159_v23, 0.0 }
  0xb2   :  { %v160_v24 = vpop.f32.mrf.mxu0 }
  0xb3   :  { %v161_v25 = vadd.f32 %v471_v22, %v160_v24 }
  0xb5   :  { %v164_v27 = vmax.f32 %v161_v25, 0.0 }
  0xb7   :  { %v165_v28 = vpack.c.bf16 %v164_v27, %v163_v26 }
  0xb9   :  { %242 = vmatmul.bf16.vlgmr.msra.gmra.mxu1 %v165_v28 }
 0x136   :  { %v243_v33 = vpop.f32.mrf.mxu1 }
 0x137   :  { %v244_v35 = vadd.f32 %v472_v34, %v243_v33 }
 0x139   :  { %v248_v38 = vmax.f32 %v244_v35, 0.0 }
 0x13e   :  { %v245_v36 = vpop.f32.mrf.mxu1 }
 0x13f   :  { %v246_v37 = vadd.f32 %v472_v34, %v245_v36 }
 0x141   :  { %v249_v39 = vmax.f32 %v246_v37, 0.0 }
 0x143   :  { %v250_v40 = vpack.c.bf16 %v249_v39, %v248_v38 }
 0x145   :  { %327 = vmatmul.bf16.vlgmr.msra.gmra.mxu2 %v250_v40 }
 0x1c8   :  { %v328_v42 = vpop.f32.mrf.mxu2 }
 0x1c9   :  { %v329_v43 = vadd.f32 %v473_v41, %v328_v42 }
 0x1cb   :  { %333 = vst [vmem:[%s629_s7] sm:$0xff] %v329_v43 }
 0x1d0   :  { %v330_v44 = vpop.f32.mrf.mxu2 }
 0x1d1   :  { %v331_v45 = vadd.f32 %v473_v41, %v330_v44 }
 0x1d3   :  { %334 = vst [vmem:[%s629_s7 + $0x8] sm:$0xff] %v331_v45 }
 0x1d4   :  { %339 = vsyncpa [#allocation3], 1 }
 0x1d5   :  { %340 = vsyncpa [#allocation5], 1 }

</bundles_post_ra>
